<compile_context>
chip_gen: v6e
topology: v6e:2x2x1
jax: 0.10.0
libtpu: 0.0.40
codegen_flags: <defaults>
</compile_context>

<pallas_src>
import jax
import jax.numpy as jnp
from jax.experimental import pallas as pl
from jax.experimental.pallas import tpu as pltpu

_MiB = 1024 * 1024

# Native sublane tile per dtype width (f32 -> 8, bf16 -> 16, int8/fp8 -> 32).
_SUBLANE = {4: 8, 2: 16, 1: 32}


def _affine_kernel(m_ref, b_ref, x_ref, o_ref):
    # m_ref / b_ref are (1, 1) f32 scalars in SMEM; x_ref / o_ref are VMEM tiles.
    m = m_ref[0, 0]
    b = b_ref[0, 0]
    o_ref[...] = (x_ref[...] * m + b).astype(o_ref.dtype)


def _hardware():
    """Best-effort chip introspection; conservative defaults when unknown."""
    num_tc, target, vmem_phys, is_v7 = 1, 2 * _MiB, 128 * _MiB, False
    kind = ""
    try:
        kind = (getattr(jax.devices()[0], "device_kind", "") or "").lower()
    except Exception:
        pass
    k = kind.replace(" ", "")
    if "v7" in k or "7x" in k:
        # v7x: ~3.2 TB/s HBM per TC, 2 TCs/chip, 64 MiB VMEM per TC.
        num_tc, target, vmem_phys, is_v7 = 2, 8 * _MiB, 64 * _MiB, True
    elif "v4" in k or "v5p" in k or ("v5" in k and "lite" not in k and "v5e" not in k):
        # Megacore chips: 2 TensorCores, parallel grid axes shard across them.
        num_tc, target = 2, 4 * _MiB
    else:
        # v5e / v6e: single TensorCore; 2 MiB tiles are already past the knee.
        num_tc, target = 1, 2 * _MiB
    try:
        info = pltpu.get_tpu_info()
        vmem_phys = int(getattr(info, "vmem_capacity_bytes", vmem_phys)) or vmem_phys
    except Exception:
        pass
    return num_tc, target, vmem_phys, is_v7


def _make_x_spec(block_shape, index_map, buffers):
    # Deeper input pipelining for v7x (the body is a few VPU ops, each step is
    # nearly pure DMA). Guarded: fall back to default double-buffering if this
    # JAX version does not accept pipeline_mode.
    if buffers > 2 and hasattr(pl, "Buffered"):
        try:
            return pl.BlockSpec(block_shape, index_map,
                                pipeline_mode=pl.Buffered(buffers))
        except TypeError:
            pass
    return pl.BlockSpec(block_shape, index_map)


def _run_affine(x_nd, m_arr, b_arr, block_shape, index_map, grid,
                out_dtype, vmem_phys, in_buffers, alias_input):
    total = x_nd.size
    itemsize = jnp.dtype(x_nd.dtype).itemsize
    block_bytes = itemsize
    for d in block_shape:
        block_bytes *= int(d)
    # input buffers + double-buffered output + margin, clamped to physical VMEM.
    vmem_limit = int(min(max(32 * _MiB, (in_buffers + 2) * block_bytes + 4 * _MiB),
                         vmem_phys))
    return pl.pallas_call(
        _affine_kernel,
        out_shape=jax.ShapeDtypeStruct(x_nd.shape, out_dtype),
        grid_spec=pltpu.PrefetchScalarGridSpec(
            num_scalar_prefetch=0,
            grid=grid,
            in_specs=[
                pl.BlockSpec(memory_space=pltpu.SMEM),        # multiplier
                pl.BlockSpec(memory_space=pltpu.SMEM),        # bias
                _make_x_spec(block_shape, index_map, in_buffers),
            ],
            out_specs=pl.BlockSpec(block_shape, index_map),
        ),
        compiler_params=pltpu.CompilerParams(
            # TODO(synk): if "parallel" does not shard across both v7x TCs,
            # switch to a leading size-2 axis with pltpu.CORE_PARALLEL.
            dimension_semantics=("parallel",),
            vmem_limit_bytes=vmem_limit,
        ),
        cost_estimate=pl.CostEstimate(
            flops=2 * total,
            transcendentals=0,
            bytes_accessed=2 * total * itemsize,
        ),
        # Aliasing the data operand onto the output removes the separate HBM
        # output allocation. Only pays off when the caller's buffer is
        # donatable (e.g. inside jit); off by default so the standalone eager
        # test does not force a defensive copy.
        input_output_aliases=({2: 0} if alias_input else {}),
    )(m_arr, b_arr, x_nd)


def affine_block(hidden_states, multiplier, bias, *,
                 target_block_bytes=None, alias_input=False):
    """out = hidden_states * multiplier + bias (scalar multiplier / bias).

    `hidden_states` must be an ordinary (row-major) JAX array so the
    flattening reshape is a free bitcast; a freshly transposed/strided view
    would add a hidden HBM copy outside the kernel.
    In production jit paths with a donatable buffer, pass alias_input=True.
    """
    orig_shape = hidden_states.shape
    orig_dtype = hidden_states.dtype
    total = int(hidden_states.size)
    itemsize = jnp.dtype(orig_dtype).itemsize
    sub = _SUBLANE.get(itemsize, 8)

    # PyTorch semantics: float parameters promote integer inputs to float32.
    out_dtype = orig_dtype if jnp.issubdtype(orig_dtype, jnp.floating) else jnp.float32
    alias_ok = bool(alias_input) and out_dtype == orig_dtype

    num_tc, hw_target, vmem_phys, is_v7 = _hardware()
    target = int(target_block_bytes) if target_block_bytes else hw_target
    single_cap = max(target, 8 * _MiB) if target_block_bytes is None else target

    m_arr = jnp.asarray(multiplier, dtype=jnp.float32).reshape(1, 1)
    b_arr = jnp.asarray(bias, dtype=jnp.float32).reshape(1, 1)

    if total == 0:
        return jnp.zeros(orig_shape, out_dtype)

    # ---- Path A: exact lane-dense 2-D slab (no padding). -------------------
    if total % 128 == 0:
        cols = 128
        while cols * 2 <= 2048 and total % (cols * 2) == 0:
            cols *= 2
        rows = total // cols
        while rows % sub != 0 and cols > 128:    # prefer sublane-aligned rows
            cols //= 2
            rows = total // cols

        rt, grid = None, None
        if rows % sub == 0:
            budget_rows = max(sub, (target // (cols * itemsize)) // sub * sub)
            rt = min(rows, budget_rows)
            if num_tc == 1 and rows * cols * itemsize <= single_cap:
                # Single TensorCore: one big block, no pointless step boundaries.
                rt = rows
            if num_tc > 1 and rows >= 2 * num_tc * sub:
                # >= 2 steps per TensorCore so each core keeps double-buffering.
                rt = min(rt, max(sub, (rows // (2 * num_tc)) // sub * sub))
            rt = max(sub, (rt // sub) * sub)
            # Snap to the largest sublane-aligned divisor of rows <= rt.
            d = rt
            while rows % d != 0:
                d -= sub
            if d == rt or d * cols * itemsize >= min(target, 512 * 1024):
                rt, grid = d, (rows // d,)
            else:
                # rows has a large prime factor: an exact divisor would force
                # tiny (64 KiB-class) blocks, a 2-3x bandwidth cliff. Keep the
                # target-sized tile; Pallas masks the ragged last block.
                grid = (pl.cdiv(rows, rt),)
        elif rows * cols * itemsize <= single_cap:
            # Small ragged row count: one full-array block (block dims equal
            # to the full array dims are exempt from the (8,128) rule).
            rt, grid = rows, (1,)

        if rt is not None:
            x2d = hidden_states.reshape(rows, cols)
            in_buffers = 3 if (is_v7 and grid[0] >= 3) else 2
            out2d = _run_affine(x2d, m_arr, b_arr, (rt, cols),
                                lambda i: (i, 0), grid, out_dtype,
                                vmem_phys, in_buffers, alias_ok)
            return out2d.reshape(orig_shape)

    # ---- Path B: tile the natural N-D shape over its leading dims. ---------
    # Blocks carry the full trailing two dims (exempt from the (8,128) rule),
    # so arbitrary element counts need zero pad/slice HBM passes.
    if len(orig_shape) == 0:
        x3 = hidden_states.reshape(1, 1, 1)
    elif len(orig_shape) == 1:
        x3 = hidden_states.reshape(1, 1, orig_shape[0])
    elif len(orig_shape) == 2:
        x3 = hidden_states.reshape(1, orig_shape[0], orig_shape[1])
    else:
        lead = 1
        for d in orig_shape[:-2]:
            lead *= int(d)
        x3 = hidden_states.reshape(lead, orig_shape[-2], orig_shape[-1])
    L, d1, d2 = (int(s) for s in x3.shape)
    row_bytes = max(d1 * d2 * itemsize, 1)
    lb = max(1, min(L, target // row_bytes))
    while L % lb != 0:                           # largest divisor of L <= budget
        lb -= 1
    if num_tc > 1 and L // lb < 2 * num_tc and lb > 1:
        lb2 = max(1, L // (2 * num_tc))          # spread across TensorCores
        while L % lb2 != 0:
            lb2 -= 1
        lb = lb2
    grid = (L // lb,)
    in_buffers = 3 if (is_v7 and grid[0] >= 3) else 2
    # TODO(synk): a single non-128-multiple trailing slice larger than the VMEM
    # budget would need a masked lane-ragged tiling; not needed for UNet shapes.
    out3 = _run_affine(x3, m_arr, b_arr, (lb, d1, d2),
                       lambda i: (i, 0, 0), grid, out_dtype,
                       vmem_phys, in_buffers, alias_ok)
    return out3.reshape(orig_shape)


if __name__ == "__main__":
    key = jax.random.PRNGKey(0)
    k_x, k_m, k_b = jax.random.split(key, 3)

    # NCHW input, consistent with UNet usage of AffineBlock.
    x = jax.random.normal(k_x, (2, 4, 16, 16), dtype=jnp.float32)

    # Deterministically-initialized scalar parameters (multipiler, bias).
    multiplier = jax.random.normal(k_m, (), dtype=jnp.float32)
    bias = jax.random.normal(k_b, (), dtype=jnp.float32)

    out = jax.block_until_ready(affine_block(x, multiplier, bias))
    ref = x * multiplier + bias
    assert out.shape == x.shape and out.dtype == x.dtype
    assert jnp.allclose(out, ref, atol=1e-6, rtol=1e-6)

    # Exact lane-dense tiled path with a multi-step grid (16 MiB of f32).
    x2 = jax.random.normal(k_x, (16, 32, 64, 128), dtype=jnp.float32)
    out2 = jax.block_until_ready(affine_block(x2, multiplier, bias))
    assert jnp.allclose(out2, x2 * multiplier + bias, atol=1e-6, rtol=1e-6)

    # Non-128-divisible element count -> natural-shape path (no padding pass).
    x3 = jax.random.normal(k_x, (3, 5, 7, 11), dtype=jnp.float32)
    out3 = jax.block_until_ready(affine_block(x3, multiplier, bias))
    assert jnp.allclose(out3, x3 * multiplier + bias, atol=1e-6, rtol=1e-6)

    # bf16 input (16-row sublane alignment); computed in f32, cast back.
    x4 = jax.random.normal(k_x, (2, 8, 32, 128), dtype=jnp.bfloat16)
    out4 = jax.block_until_ready(affine_block(x4, multiplier, bias))
    ref4 = (x4.astype(jnp.float32) * multiplier + bias).astype(jnp.bfloat16)
    assert out4.dtype == jnp.bfloat16
    assert jnp.allclose(out4.astype(jnp.float32), ref4.astype(jnp.float32),
                        atol=1e-2, rtol=1e-2)

    print("KERNEL_OK")
</pallas_src>

<mosaic_0001>
module attributes {stable_mosaic.version = 11 : i64} {
  func.func @_affine_kernel(%arg0: i32, %arg1: memref<1x1xf32, #tpu.memory_space<smem>>, %arg2: memref<1x1xf32, #tpu.memory_space<smem>>, %arg3: memref<8x256xf32, #tpu.memory_space<vmem>>, %arg4: memref<8x256xf32, #tpu.memory_space<vmem>>) attributes {dimension_semantics = [#tpu.dimension_semantics<parallel>], iteration_bounds = array<i64: 1>, scalar_prefetch = 0 : i64, scratch_operands = 0 : i64, tpu.core_type = #tpu.core_type<tc>, window_params = [{transform_indices = @transform_0, window_bounds = array<i64: 1, 1>}, {transform_indices = @transform_1, window_bounds = array<i64: 1, 1>}, {transform_indices = @transform_2, window_bounds = array<i64: 8, 256>}, {transform_indices = @transform_3, window_bounds = array<i64: 8, 256>}]} {
    %c0 = arith.constant 0 : index
    %c0_0 = arith.constant 0 : index
    %0 = memref.load %arg1[%c0, %c0_0] : memref<1x1xf32, #tpu.memory_space<smem>>
    %c0_1 = arith.constant 0 : index
    %c0_2 = arith.constant 0 : index
    %1 = memref.load %arg2[%c0_1, %c0_2] : memref<1x1xf32, #tpu.memory_space<smem>>
    %c0_3 = arith.constant 0 : index
    %c0_4 = arith.constant 0 : index
    %2 = vector.load %arg3[%c0_3, %c0_4] : memref<8x256xf32, #tpu.memory_space<vmem>>, vector<8x256xf32>
    %3 = vector.broadcast %0 : f32 to vector<8x256xf32>
    %4 = arith.mulf %2, %3 : vector<8x256xf32>
    %5 = vector.broadcast %1 : f32 to vector<8x256xf32>
    %6 = arith.addf %4, %5 : vector<8x256xf32>
    %c0_5 = arith.constant 0 : index
    %c0_6 = arith.constant 0 : index
    %7 = vector.load %arg4[%c0_5, %c0_6] : memref<8x256xf32, #tpu.memory_space<vmem>>, vector<8x256xf32>
    tpu.vector_store %arg4[%c0_5, %c0_6], %6 {strides = array<i32>} : memref<8x256xf32, #tpu.memory_space<vmem>>, vector<8x256xf32>,
    return
  }
  func.func @transform_0(%arg0: i32) -> (i32, i32) {
    %c0_i32 = arith.constant 0 : i32
    %c0_i32_0 = arith.constant 0 : i32
    %c0_i32_1 = arith.constant 0 : i32
    return %c0_i32, %c0_i32_0 : i32, i32
  }
  func.func @transform_1(%arg0: i32) -> (i32, i32) {
    %c0_i32 = arith.constant 0 : i32
    %c0_i32_0 = arith.constant 0 : i32
    %c0_i32_1 = arith.constant 0 : i32
    return %c0_i32, %c0_i32_0 : i32, i32
  }
  func.func @transform_2(%arg0: i32) -> (i32, i32) {
    %c0_i32 = arith.constant 0 : i32
    %c0_i32_0 = arith.constant 0 : i32
    return %arg0, %c0_i32 : i32, i32
  }
  func.func @transform_3(%arg0: i32) -> (i32, i32) {
    %c0_i32 = arith.constant 0 : i32
    %c0_i32_0 = arith.constant 0 : i32
    return %arg0, %c0_i32 : i32, i32
  }
}

</mosaic_0001>

<bundles_post_ra>
// kernel: tpu_custom_call.1
= control target key start
LH: loop header
LB: loop body
LE: loop exit
PB: predicated region body
PF: predicated region fallthrough
CT: control target
= control target key end

     0   :  { %10 = vsyncpa [#allocation5], 0  ;;  %s136_s0 = inlined_call_operand.<no memory space> [shape: f32[1,1], index: 0, kind: input, shape index: {}]   ;;  %s137_s1 = inlined_call_operand.<no memory space> [shape: f32[1,1], index: 1, kind: input, shape index: {}]   ;;  %s138_s2 = inlined_call_operand.hbm [shape: f32[8,256], index: 2, kind: input, shape index: {}]   ;;  %s139_s3 = inlined_call_operand.hbm [shape: f32[8,256], index: 3, kind: output, shape index: {}]  }
   0x1   :  { %11 = vsyncpa [#allocation6], 0  ;;  %s102_s12 = smov [#allocation4]  }
   0x2   :  { %s22_s13 = sshll.u32 %s102_s12, 4  ;;  %s23_s13 = int_to_ptr.vmem [resolvable:$true] %s22_s13 }
   0x3   :  { %s66_s14 = scalar_lea.vmem %s23_s13, 256  ;;  %p71_p1 = scmp.lt.s32.totalorder %s23_s13, %s23_s13 }
   0x4   :  { %p67_p0 = scmp.ne.s32.totalorder %s23_s13, %s66_s14  ;;  %p72_p2 = scmp.lt.s32.totalorder %s66_s14, %s66_s14 }
   0x6   :  { %p73_p3 = por %p72_p2, %p71_p1 }
   0x8   :  { %p74_p4 = pnand %p73_p3, %p67_p0 }
   0xa   :  { %77 = shalt.err (!%p74_p4)
}
   0xb   :  { %25 = dma.hbm_to_vmem [thread:$0]  %s138_s2, 256, %s23_s13, [#allocation5]  }
   0xc   :  { %98 = dma.done.wait [#allocation5], 256  }
   0xd   :  { %99 = vsyncadd [#allocation5], 4294967040  ;;  %v33_v0 = vstv %s136_s0  ;;  %v31_v1 = vld [vmem:[#allocation4] sm:$0xff]  ;;  %v36_v2 = vstv %s137_s1  ;;  %v32_v3 = vld [vmem:[#allocation4 + $0x8] sm:$0xff]  ;;  %s103_s21 = smov [#allocation7]  }
   0xe   :  { %s47_s22 = sshll.u32 %s103_s21, 4  ;;  %v34_v4 = vmul.f32 %v33_v0, %v31_v1  ;;  %v35_v5 = vmul.f32 %v33_v0, %v32_v3  ;;  %s48_s22 = int_to_ptr.vmem [resolvable:$true] %s47_s22 }
   0xf   :  { %s78_s2 = scalar_lea.vmem %s48_s22, 256  ;;  %p83_p6 = scmp.lt.s32.totalorder %s48_s22, %s48_s22 }
  0x10   :  { %v37_v6 = vadd.f32 %v36_v2, %v34_v4  ;;  %v38_v7 = vadd.f32 %v36_v2, %v35_v5  ;;  %p79_p5 = scmp.ne.s32.totalorder %s48_s22, %s78_s2  ;;  %p84_p7 = scmp.lt.s32.totalorder %s78_s2, %s78_s2 }
  0x12   :  { %39 = vst [vmem:[#allocation7] sm:$0xff] %v37_v6  ;;  %40 = vst [vmem:[#allocation7 + $0x8] sm:$0xff] %v38_v7  ;;  %p85_p8 = por %p84_p7, %p83_p6 }
  0x14   :  { %p86_p9 = pnand %p85_p8, %p79_p5 }
  0x16   :  { %89 = shalt.err (!%p86_p9)
}
  0x17   :  { %50 = dma.vmem_to_hbm [thread:$0]  %s48_s22, 256, %s139_s3, [#allocation6]  }
  0x18   :  { %100 = dma.done.wait [#allocation6], 256  }
  0x19   :  { %101 = vsyncadd [#allocation6], 4294967040 }
  0x1a   :  { %54 = vsyncpa [#allocation5], 1 }
  0x1b   :  { %55 = vsyncpa [#allocation6], 1 }

</bundles_post_ra>
